<compile_context>
chip_gen: v6e
topology: v6e:2x2x1
jax: 0.10.0
libtpu: 0.0.40
codegen_flags: <defaults>
</compile_context>

<pallas_src>
import math
import functools

import jax
import jax.numpy as jnp
from jax.experimental import pallas as pl
from jax.experimental.pallas import tpu as pltpu


# ---------------------------------------------------------------------------
# Kernel
# ---------------------------------------------------------------------------
def _attention_head_kernel(x_ref, wq_ref, bq_ref, wk_ref, bk_ref, wv_ref,
                           bv_ref, wo_ref, bo_ref, cos_ref, sin_ref,
                           o_ref, acc_ref, *, head_dim):
    h = pl.program_id(1)
    n_heads = pl.num_programs(1)

    x = x_ref[0]                 # (S, D) bf16 — only used as MXU operand
    cos = cos_ref[...]           # (S, head_dim) f32  (per-head, permuted layout)
    sin = sin_ref[...]           # (S, head_dim) f32  (sign already folded in)

    # Projections for this head: bf16 MXU inputs, f32 accumulation.
    q = jnp.dot(x, wq_ref[...], preferred_element_type=jnp.float32) + bq_ref[...]
    k = jnp.dot(x, wk_ref[...], preferred_element_type=jnp.float32) + bk_ref[...]
    v = jnp.dot(x, wv_ref[...], preferred_element_type=jnp.float32) + bv_ref[...]

    def rope(t):
        # rotate-half form (wq/wk columns were pre-permuted per head at init;
        # the RoPE sign is folded into `sin`).  Equivalent to
        # pltpu.roll(t, shift=head_dim // 2, axis=1) on the XLU.
        rot = jnp.concatenate([t[:, head_dim // 2:], t[:, :head_dim // 2]], axis=1)
        return t * cos + rot * sin

    q = rope(q)                  # 1/sqrt(head_dim) already folded into wq/bq
    k = rope(k)

    # scores = q @ k^T  (contract last dims; no explicit transpose)
    s = jax.lax.dot_general(q.astype(jnp.bfloat16), k.astype(jnp.bfloat16),
                            (((1,), (1,)), ((), ())),
                            preferred_element_type=jnp.float32)      # (S, S)

    # Causal mask synthesized in-kernel (no (S,S) operand in HBM/VMEM).
    row = jax.lax.broadcasted_iota(jnp.int32, s.shape, 0)
    col = jax.lax.broadcasted_iota(jnp.int32, s.shape, 1)
    s = jnp.where(col <= row, s, -1e30)

    # Softmax in f32 (VPU math stays f32 — important for v5e).
    s = s - jnp.max(s, axis=-1, keepdims=True)
    p = jnp.exp(s)
    p = p / jnp.sum(p, axis=-1, keepdims=True)

    head_out = jnp.dot(p.astype(jnp.bfloat16), v.astype(jnp.bfloat16),
                       preferred_element_type=jnp.float32)           # (S, hd)
    contrib = jnp.dot(head_out.astype(jnp.bfloat16), wo_ref[...],
                      preferred_element_type=jnp.float32)            # (S, D)

    @pl.when(h == 0)
    def _():
        acc_ref[...] = contrib + bo_ref[...]

    @pl.when(h != 0)
    def _():
        acc_ref[...] = acc_ref[...] + contrib

    @pl.when(h == n_heads - 1)
    def _():
        o_ref[0] = acc_ref[...]


# ---------------------------------------------------------------------------
# Wrapper
# ---------------------------------------------------------------------------
def v1_attention_forward(x, kparams, cos_t, sin_t, n_heads):
    B, S, D = x.shape
    hd = D // n_heads
    x = x.astype(jnp.bfloat16)   # halve activation DMA; MXU runs bf16 anyway

    kernel = functools.partial(_attention_head_kernel, head_dim=hd)

    return pl.pallas_call(
        kernel,
        out_shape=jax.ShapeDtypeStruct((B, S, D), jnp.float32),
        grid=(B, n_heads),
        in_specs=[
            pl.BlockSpec((1, S, D), lambda b, h: (b, 0, 0)),    # x
            pl.BlockSpec((D, hd), lambda b, h: (0, h)),         # wq (perm+scaled)
            pl.BlockSpec((1, hd), lambda b, h: (0, h)),         # bq
            pl.BlockSpec((D, hd), lambda b, h: (0, h)),         # wk (perm)
            pl.BlockSpec((1, hd), lambda b, h: (0, h)),         # bk
            pl.BlockSpec((D, hd), lambda b, h: (0, h)),         # wv
            pl.BlockSpec((1, hd), lambda b, h: (0, h)),         # bv
            pl.BlockSpec((hd, D), lambda b, h: (h, 0)),         # wo (row block)
            pl.BlockSpec((1, D), lambda b, h: (0, 0)),          # bo
            pl.BlockSpec((S, hd), lambda b, h: (0, h)),         # cos table
            pl.BlockSpec((S, hd), lambda b, h: (0, h)),         # sin table
        ],
        out_specs=pl.BlockSpec((1, S, D), lambda b, h: (b, 0, 0)),
        scratch_shapes=[pltpu.VMEM((S, D), jnp.float32)],       # per-batch accumulator
        compiler_params=pltpu.CompilerParams(
            dimension_semantics=("parallel", "arbitrary"),
            vmem_limit_bytes=64 * 1024 * 1024),
    )(x, kparams["wq"], kparams["bq"], kparams["wk"], kparams["bk"],
      kparams["wv"], kparams["bv"], kparams["wo"], kparams["bo"],
      cos_t, sin_t)


# ---------------------------------------------------------------------------
# One-time parameter / table preparation (weight transforms, not per-call ops)
# ---------------------------------------------------------------------------
def init_params(key, dim):
    keys = jax.random.split(key, 8)
    bound = 1.0 / math.sqrt(dim)

    def lin(kw, kb):
        w = jax.random.uniform(kw, (dim, dim), jnp.float32, -bound, bound)
        b = jax.random.uniform(kb, (1, dim), jnp.float32, -bound, bound)
        return w, b

    wq, bq = lin(keys[0], keys[1])
    wk, bk = lin(keys[2], keys[3])
    wv, bv = lin(keys[4], keys[5])
    wo, bo = lin(keys[6], keys[7])
    return dict(wq=wq, bq=bq, wk=wk, bk=bk, wv=wv, bv=bv, wo=wo, bo=bo)


def _head_rotate_half_perm(dim, n_heads):
    """Within-head column permutation: interleaved pairs -> [evens | odds]."""
    hd = dim // n_heads
    perm = []
    for h in range(n_heads):
        base = h * hd
        perm.extend(base + 2 * j for j in range(hd // 2))       # real parts
        perm.extend(base + 2 * j + 1 for j in range(hd // 2))   # imag parts
    return jnp.asarray(perm, dtype=jnp.int32)


def prepare_params(params, dim, n_heads):
    """Permute wq/wk columns per head (score-invariant), fold the attention
    scale into wq/bq, and cast weights to bf16 for the MXU."""
    perm = _head_rotate_half_perm(dim, n_heads)
    scale = 1.0 / math.sqrt(dim // n_heads)
    return dict(
        wq=(params["wq"][:, perm] * scale).astype(jnp.bfloat16),
        bq=(params["bq"][:, perm] * scale).astype(jnp.float32),
        wk=params["wk"][:, perm].astype(jnp.bfloat16),
        bk=params["bk"][:, perm].astype(jnp.float32),
        wv=params["wv"].astype(jnp.bfloat16),
        bv=params["bv"].astype(jnp.float32),
        wo=params["wo"].astype(jnp.bfloat16),
        bo=params["bo"].astype(jnp.float32),
    )


def rope_tables(seq_len, dim, n_heads, theta=10000.0):
    """cos_h/sin_h: reference interleaved tables (S, dim//2).
    cos_t/sin_t: kernel tables (S, dim) in per-head rotate-half layout with
    the RoPE sign folded into sin_t."""
    half = dim // 2
    freqs = 1.0 / theta ** (jnp.arange(0, dim, 2, dtype=jnp.float32)[:half] / dim)
    pos = jnp.arange(seq_len, dtype=jnp.float32)
    angles = jnp.outer(pos, freqs)                       # (S, dim//2)
    cos_h, sin_h = jnp.cos(angles), jnp.sin(angles)

    hd = dim // n_heads
    c = jnp.arange(dim)
    pair = (c // hd) * (hd // 2) + (c % hd) % (hd // 2)  # pair index per column
    sign = jnp.where((c % hd) < hd // 2, -1.0, 1.0).astype(jnp.float32)
    cos_t = cos_h[:, pair]                               # (S, dim)
    sin_t = sin_h[:, pair] * sign[None, :]
    return cos_h, sin_h, cos_t, sin_t


# ---------------------------------------------------------------------------
# Pure-JAX f32 reference (mirrors the PyTorch forward, start_pos = 0)
# ---------------------------------------------------------------------------
def ref_forward(x, params, cos_h, sin_h, mask, n_heads):
    B, S, D = x.shape
    hd = D // n_heads
    q = x @ params["wq"] + params["bq"]
    k = x @ params["wk"] + params["bk"]
    v = x @ params["wv"] + params["bv"]

    def rope(t):
        t2 = t.reshape(B, S, D // 2, 2)
        tr, ti = t2[..., 0], t2[..., 1]
        rr = tr * cos_h - ti * sin_h
        ri = tr * sin_h + ti * cos_h
        return jnp.stack([rr, ri], axis=-1).reshape(B, S, D)

    q, k = rope(q), rope(k)
    qh = q.reshape(B, S, n_heads, hd).transpose(0, 2, 1, 3)
    kh = k.reshape(B, S, n_heads, hd).transpose(0, 2, 1, 3)
    vh = v.reshape(B, S, n_heads, hd).transpose(0, 2, 1, 3)
    scores = jnp.einsum("bhqd,bhkd->bhqk", qh, kh) / math.sqrt(hd) + mask
    p = jax.nn.softmax(scores, axis=-1)
    o = jnp.einsum("bhqk,bhkd->bhqd", p, vh).transpose(0, 2, 1, 3).reshape(B, S, D)
    return o @ params["wo"] + params["bo"]


if __name__ == "__main__":
    # Small config consistent with V1ModelArgs: dim % n_heads == 0, head_dim = 128
    # so per-head blocks are lane-aligned (real llama also uses head_dim = 128).
    B, S, D, H = 2, 8, 256, 2

    key = jax.random.PRNGKey(0)
    kx, kp = jax.random.split(key)
    x = jax.random.normal(kx, (B, S, D), jnp.float32)
    params = init_params(kp, D)

    cos_h, sin_h, cos_t, sin_t = rope_tables(S, D, H)
    kparams = prepare_params(params, D, H)

    out = v1_attention_forward(x, kparams, cos_t, sin_t, H)
    out = jax.block_until_ready(out)

    # Reference stays in full f32 (true module semantics); kernel runs bf16 on
    # the MXU, so compare with a bf16-appropriate tolerance.
    mask = jnp.triu(jnp.full((S, S), float("-inf"), dtype=jnp.float32), k=1)
    ref = ref_forward(x, params, cos_h, sin_h, mask, H)

    assert out.shape == (B, S, D)
    max_err = float(jnp.max(jnp.abs(out - ref)))
    assert jnp.allclose(out, ref, atol=5e-2, rtol=5e-2), f"max abs err = {max_err}"

    print("KERNEL_OK")
</pallas_src>

<mosaic_0001>
module attributes {stable_mosaic.version = 11 : i64} {
  func.func @_attention_head_kernel(%arg0: i32, %arg1: i32, %arg2: memref<1x8x256xbf16, #tpu.memory_space<vmem>>, %arg3: memref<256x128xbf16, #tpu.memory_space<vmem>>, %arg4: memref<1x128xf32, #tpu.memory_space<vmem>>, %arg5: memref<256x128xbf16, #tpu.memory_space<vmem>>, %arg6: memref<1x128xf32, #tpu.memory_space<vmem>>, %arg7: memref<256x128xbf16, #tpu.memory_space<vmem>>, %arg8: memref<1x128xf32, #tpu.memory_space<vmem>>, %arg9: memref<128x256xbf16, #tpu.memory_space<vmem>>, %arg10: memref<1x256xf32, #tpu.memory_space<vmem>>, %arg11: memref<8x128xf32, #tpu.memory_space<vmem>>, %arg12: memref<8x128xf32, #tpu.memory_space<vmem>>, %arg13: memref<1x8x256xf32, #tpu.memory_space<vmem>>, %arg14: memref<8x256xf32, #tpu.memory_space<vmem>>) attributes {dimension_semantics = [#tpu.dimension_semantics<parallel>, #tpu.dimension_semantics<arbitrary>], iteration_bounds = array<i64: 2, 2>, scalar_prefetch = 0 : i64, scratch_operands = 1 : i64, tpu.core_type = #tpu.core_type<tc>, window_params = [{transform_indices = @transform_0, window_bounds = array<i64: 1, 8, 256>}, {transform_indices = @transform_1, window_bounds = array<i64: 256, 128>}, {transform_indices = @transform_2, window_bounds = array<i64: 1, 128>}, {transform_indices = @transform_3, window_bounds = array<i64: 256, 128>}, {transform_indices = @transform_4, window_bounds = array<i64: 1, 128>}, {transform_indices = @transform_5, window_bounds = array<i64: 256, 128>}, {transform_indices = @transform_6, window_bounds = array<i64: 1, 128>}, {transform_indices = @transform_7, window_bounds = array<i64: 128, 256>}, {pipeline_mode = #tpu.pipeline_mode<synchronous>, transform_indices = @transform_8, window_bounds = array<i64: 1, 256>}, {transform_indices = @transform_9, window_bounds = array<i64: 8, 128>}, {transform_indices = @transform_10, window_bounds = array<i64: 8, 128>}, {transform_indices = @transform_11, window_bounds = array<i64: 1, 8, 256>}]} {
    %c0 = arith.constant 0 : index
    %c0_0 = arith.constant 0 : index
    %c0_1 = arith.constant 0 : index
    %0 = vector.load %arg2[%c0, %c0_0, %c0_1] : memref<1x8x256xbf16, #tpu.memory_space<vmem>>, vector<1x8x256xbf16>
    %1 = vector.shape_cast %0 : vector<1x8x256xbf16> to vector<8x256xbf16>
    %c0_2 = arith.constant 0 : index
    %c0_3 = arith.constant 0 : index
    %2 = vector.load %arg11[%c0_2, %c0_3] : memref<8x128xf32, #tpu.memory_space<vmem>>, vector<8x128xf32>
    %c0_4 = arith.constant 0 : index
    %c0_5 = arith.constant 0 : index
    %3 = vector.load %arg12[%c0_4, %c0_5] : memref<8x128xf32, #tpu.memory_space<vmem>>, vector<8x128xf32>
    %c0_6 = arith.constant 0 : index
    %c0_7 = arith.constant 0 : index
    %4 = vector.load %arg3[%c0_6, %c0_7] : memref<256x128xbf16, #tpu.memory_space<vmem>>, vector<256x128xbf16>
    %cst = arith.constant dense<0.000000e+00> : vector<8x128xf32>
    %5 = tpu.matmul %1, %4, %cst {dimension_numbers = #tpu.dot_dimension_numbers<[1], [0], [0], [1], [0, 0, 1, 1], [], []>} : vector<8x256xbf16>, vector<256x128xbf16>, vector<8x128xf32> -> vector<8x128xf32>
    %c0_8 = arith.constant 0 : index
    %c0_9 = arith.constant 0 : index
    %6 = vector.load %arg4[%c0_8, %c0_9] : memref<1x128xf32, #tpu.memory_space<vmem>>, vector<1x128xf32>
    %7 = vector.broadcast %6 : vector<1x128xf32> to vector<8x128xf32>
    %8 = arith.addf %5, %7 : vector<8x128xf32>
    %c0_10 = arith.constant 0 : index
    %c0_11 = arith.constant 0 : index
    %9 = vector.load %arg5[%c0_10, %c0_11] : memref<256x128xbf16, #tpu.memory_space<vmem>>, vector<256x128xbf16>
    %cst_12 = arith.constant dense<0.000000e+00> : vector<8x128xf32>
    %10 = tpu.matmul %1, %9, %cst_12 {dimension_numbers = #tpu.dot_dimension_numbers<[1], [0], [0], [1], [0, 0, 1, 1], [], []>} : vector<8x256xbf16>, vector<256x128xbf16>, vector<8x128xf32> -> vector<8x128xf32>
    %c0_13 = arith.constant 0 : index
    %c0_14 = arith.constant 0 : index
    %11 = vector.load %arg6[%c0_13, %c0_14] : memref<1x128xf32, #tpu.memory_space<vmem>>, vector<1x128xf32>
    %12 = vector.broadcast %11 : vector<1x128xf32> to vector<8x128xf32>
    %13 = arith.addf %10, %12 : vector<8x128xf32>
    %c0_15 = arith.constant 0 : index
    %c0_16 = arith.constant 0 : index
    %14 = vector.load %arg7[%c0_15, %c0_16] : memref<256x128xbf16, #tpu.memory_space<vmem>>, vector<256x128xbf16>
    %cst_17 = arith.constant dense<0.000000e+00> : vector<8x128xf32>
    %15 = tpu.matmul %1, %14, %cst_17 {dimension_numbers = #tpu.dot_dimension_numbers<[1], [0], [0], [1], [0, 0, 1, 1], [], []>} : vector<8x256xbf16>, vector<256x128xbf16>, vector<8x128xf32> -> vector<8x128xf32>
    %c0_18 = arith.constant 0 : index
    %c0_19 = arith.constant 0 : index
    %16 = vector.load %arg8[%c0_18, %c0_19] : memref<1x128xf32, #tpu.memory_space<vmem>>, vector<1x128xf32>
    %17 = vector.broadcast %16 : vector<1x128xf32> to vector<8x128xf32>
    %18 = arith.addf %15, %17 : vector<8x128xf32>
    %19 = vector.extract_strided_slice %8 {offsets = [0, 64], sizes = [8, 64], strides = [1, 1]} : vector<8x128xf32> to vector<8x64xf32>
    %20 = vector.extract_strided_slice %8 {offsets = [0, 0], sizes = [8, 64], strides = [1, 1]} : vector<8x128xf32> to vector<8x64xf32>
    %21 = tpu.concatenate %19, %20 in 1 : vector<8x64xf32>, vector<8x64xf32> -> vector<8x128xf32>
    %22 = arith.mulf %8, %2 : vector<8x128xf32>
    %23 = arith.mulf %21, %3 : vector<8x128xf32>
    %24 = arith.addf %22, %23 : vector<8x128xf32>
    %25 = vector.extract_strided_slice %13 {offsets = [0, 64], sizes = [8, 64], strides = [1, 1]} : vector<8x128xf32> to vector<8x64xf32>
    %26 = vector.extract_strided_slice %13 {offsets = [0, 0], sizes = [8, 64], strides = [1, 1]} : vector<8x128xf32> to vector<8x64xf32>
    %27 = tpu.concatenate %25, %26 in 1 : vector<8x64xf32>, vector<8x64xf32> -> vector<8x128xf32>
    %28 = arith.mulf %13, %2 : vector<8x128xf32>
    %29 = arith.mulf %27, %3 : vector<8x128xf32>
    %30 = arith.addf %28, %29 : vector<8x128xf32>
    %31 = arith.truncf %24 : vector<8x128xf32> to vector<8x128xbf16>
    %32 = arith.truncf %30 : vector<8x128xf32> to vector<8x128xbf16>
    %cst_20 = arith.constant dense<0.000000e+00> : vector<8x8xf32>
    %33 = tpu.matmul %31, %32, %cst_20 {dimension_numbers = #tpu.dot_dimension_numbers<[1], [1], [0], [0], [0, 0, 1, 0], [], []>} : vector<8x128xbf16>, vector<8x128xbf16>, vector<8x8xf32> -> vector<8x8xf32>
    %34 = tpu.iota {dimensions = array<i32: 0>} : vector<8x8xi32>
    %35 = tpu.iota {dimensions = array<i32: 1>} : vector<8x8xi32>
    %36 = arith.cmpi sle, %35, %34 : vector<8x8xi32>
    %cst_21 = arith.constant -1.000000e+30 : f32
    %37 = vector.broadcast %cst_21 : f32 to vector<8x8xf32>
    %38 = arith.select %36, %33, %37 : vector<8x8xi1>, vector<8x8xf32>
    %cst_22 = arith.constant dense<0xFF800000> : vector<8xf32>
    %39 = vector.multi_reduction <maximumf>, %38, %cst_22 [1] : vector<8x8xf32> to vector<8xf32>
    %40 = vector.shape_cast %39 : vector<8xf32> to vector<8x1xf32>
    %41 = vector.broadcast %40 : vector<8x1xf32> to vector<8x8xf32>
    %42 = arith.subf %38, %41 : vector<8x8xf32>
    %43 = math.exp %42 : vector<8x8xf32>
    %cst_23 = arith.constant dense<0.000000e+00> : vector<8xf32>
    %44 = vector.multi_reduction <add>, %43, %cst_23 [1] : vector<8x8xf32> to vector<8xf32>
    %45 = vector.shape_cast %44 : vector<8xf32> to vector<8x1xf32>
    %46 = vector.broadcast %45 : vector<8x1xf32> to vector<8x8xf32>
    %47 = arith.divf %43, %46 : vector<8x8xf32>
    %48 = arith.truncf %47 : vector<8x8xf32> to vector<8x8xbf16>
    %49 = arith.truncf %18 : vector<8x128xf32> to vector<8x128xbf16>
    %cst_24 = arith.constant dense<0.000000e+00> : vector<8x128xf32>
    %50 = tpu.matmul %48, %49, %cst_24 {dimension_numbers = #tpu.dot_dimension_numbers<[1], [0], [0], [1], [0, 0, 1, 1], [], []>} : vector<8x8xbf16>, vector<8x128xbf16>, vector<8x128xf32> -> vector<8x128xf32>
    %51 = arith.truncf %50 : vector<8x128xf32> to vector<8x128xbf16>
    %c0_25 = arith.constant 0 : index
    %c0_26 = arith.constant 0 : index
    %52 = vector.load %arg9[%c0_25, %c0_26] : memref<128x256xbf16, #tpu.memory_space<vmem>>, vector<128x256xbf16>
    %cst_27 = arith.constant dense<0.000000e+00> : vector<8x256xf32>
    %53 = tpu.matmul %51, %52, %cst_27 {dimension_numbers = #tpu.dot_dimension_numbers<[1], [0], [0], [1], [0, 0, 1, 1], [], []>} : vector<8x128xbf16>, vector<128x256xbf16>, vector<8x256xf32> -> vector<8x256xf32>
    %c0_i32 = arith.constant 0 : i32
    %54 = arith.cmpi eq, %arg1, %c0_i32 : i32
    %55 = arith.extui %54 : i1 to i32
    %c0_i32_28 = arith.constant 0 : i32
    %56 = arith.cmpi ne, %55, %c0_i32_28 : i32
    scf.if %56 {
      %c0_32 = arith.constant 0 : index
      %c0_33 = arith.constant 0 : index
      %63 = vector.load %arg10[%c0_32, %c0_33] : memref<1x256xf32, #tpu.memory_space<vmem>>, vector<1x256xf32>
      %64 = vector.broadcast %63 : vector<1x256xf32> to vector<8x256xf32>
      %65 = arith.addf %53, %64 : vector<8x256xf32>
      %c0_34 = arith.constant 0 : index
      %c0_35 = arith.constant 0 : index
      %66 = vector.load %arg14[%c0_34, %c0_35] : memref<8x256xf32, #tpu.memory_space<vmem>>, vector<8x256xf32>
      tpu.vector_store %arg14[%c0_34, %c0_35], %65 {strides = array<i32>} : memref<8x256xf32, #tpu.memory_space<vmem>>, vector<8x256xf32>,
    } else {
    }
    %c0_i32_29 = arith.constant 0 : i32
    %57 = arith.cmpi ne, %arg1, %c0_i32_29 : i32
    %58 = arith.extui %57 : i1 to i32
    %c0_i32_30 = arith.constant 0 : i32
    %59 = arith.cmpi ne, %58, %c0_i32_30 : i32
    scf.if %59 {
      %c0_32 = arith.constant 0 : index
      %c0_33 = arith.constant 0 : index
      %63 = vector.load %arg14[%c0_32, %c0_33] : memref<8x256xf32, #tpu.memory_space<vmem>>, vector<8x256xf32>
      %64 = arith.addf %63, %53 : vector<8x256xf32>
      %c0_34 = arith.constant 0 : index
      %c0_35 = arith.constant 0 : index
      %65 = vector.load %arg14[%c0_34, %c0_35] : memref<8x256xf32, #tpu.memory_space<vmem>>, vector<8x256xf32>
      tpu.vector_store %arg14[%c0_34, %c0_35], %64 {strides = array<i32>} : memref<8x256xf32, #tpu.memory_space<vmem>>, vector<8x256xf32>,
    } else {
    }
    %c1_i32 = arith.constant 1 : i32
    %60 = arith.cmpi eq, %arg1, %c1_i32 : i32
    %61 = arith.extui %60 : i1 to i32
    %c0_i32_31 = arith.constant 0 : i32
    %62 = arith.cmpi ne, %61, %c0_i32_31 : i32
    scf.if %62 {
      %c0_32 = arith.constant 0 : index
      %c0_33 = arith.constant 0 : index
      %63 = vector.load %arg14[%c0_32, %c0_33] : memref<8x256xf32, #tpu.memory_space<vmem>>, vector<8x256xf32>
      %c0_34 = arith.constant 0 : index
      %c0_35 = arith.constant 0 : index
      %c0_36 = arith.constant 0 : index
      %64 = vector.load %arg13[%c0_34, %c0_35, %c0_36] : memref<1x8x256xf32, #tpu.memory_space<vmem>>, vector<1x8x256xf32>
      %65 = vector.shape_cast %64 : vector<1x8x256xf32> to vector<8x256xf32>
      %66 = vector.shape_cast %63 : vector<8x256xf32> to vector<1x8x256xf32>
      tpu.vector_store %arg13[%c0_34, %c0_35, %c0_36], %66 {strides = array<i32>} : memref<1x8x256xf32, #tpu.memory_space<vmem>>, vector<1x8x256xf32>,
    } else {
    }
    return
  }
  func.func @transform_0(%arg0: i32, %arg1: i32) -> (i32, i32, i32) {
    %c0_i32 = arith.constant 0 : i32
    %c0_i32_0 = arith.constant 0 : i32
    %c0_i32_1 = arith.constant 0 : i32
    return %arg0, %c0_i32, %c0_i32_0 : i32, i32, i32
  }
  func.func @transform_1(%arg0: i32, %arg1: i32) -> (i32, i32) {
    %c0_i32 = arith.constant 0 : i32
    %c0_i32_0 = arith.constant 0 : i32
    return %c0_i32, %arg1 : i32, i32
  }
  func.func @transform_2(%arg0: i32, %arg1: i32) -> (i32, i32) {
    %c0_i32 = arith.constant 0 : i32
    %c0_i32_0 = arith.constant 0 : i32
    return %c0_i32, %arg1 : i32, i32
  }
  func.func @transform_3(%arg0: i32, %arg1: i32) -> (i32, i32) {
    %c0_i32 = arith.constant 0 : i32
    %c0_i32_0 = arith.constant 0 : i32
    return %c0_i32, %arg1 : i32, i32
  }
  func.func @transform_4(%arg0: i32, %arg1: i32) -> (i32, i32) {
    %c0_i32 = arith.constant 0 : i32
    %c0_i32_0 = arith.constant 0 : i32
    return %c0_i32, %arg1 : i32, i32
  }
  func.func @transform_5(%arg0: i32, %arg1: i32) -> (i32, i32) {
    %c0_i32 = arith.constant 0 : i32
    %c0_i32_0 = arith.constant 0 : i32
    return %c0_i32, %arg1 : i32, i32
  }
  func.func @transform_6(%arg0: i32, %arg1: i32) -> (i32, i32) {
    %c0_i32 = arith.constant 0 : i32
    %c0_i32_0 = arith.constant 0 : i32
    return %c0_i32, %arg1 : i32, i32
  }
  func.func @transform_7(%arg0: i32, %arg1: i32) -> (i32, i32) {
    %c0_i32 = arith.constant 0 : i32
    %c0_i32_0 = arith.constant 0 : i32
    return %arg1, %c0_i32 : i32, i32
  }
  func.func @transform_8(%arg0: i32, %arg1: i32) -> (i32, i32) {
    %c0_i32 = arith.constant 0 : i32
    %c0_i32_0 = arith.constant 0 : i32
    %c0_i32_1 = arith.constant 0 : i32
    return %c0_i32, %c0_i32_0 : i32, i32
  }
  func.func @transform_9(%arg0: i32, %arg1: i32) -> (i32, i32) {
    %c0_i32 = arith.constant 0 : i32
    %c0_i32_0 = arith.constant 0 : i32
    return %c0_i32, %arg1 : i32, i32
  }
  func.func @transform_10(%arg0: i32, %arg1: i32) -> (i32, i32) {
    %c0_i32 = arith.constant 0 : i32
    %c0_i32_0 = arith.constant 0 : i32
    return %c0_i32, %arg1 : i32, i32
  }
  func.func @transform_11(%arg0: i32, %arg1: i32) -> (i32, i32, i32) {
    %c0_i32 = arith.constant 0 : i32
    %c0_i32_0 = arith.constant 0 : i32
    %c0_i32_1 = arith.constant 0 : i32
    return %arg0, %c0_i32, %c0_i32_0 : i32, i32, i32
  }
}

</mosaic_0001>

<bundles_post_ra>
// kernel: tpu_custom_call.1
= control target key start
LH: loop header
LB: loop body
LE: loop exit
PB: predicated region body
PF: predicated region fallthrough
CT: control target
= control target key end

     0   :  { %s3284_s0 = inlined_call_operand.hbm [shape: bf16[2,8,256], index: 0, kind: input, shape index: {}]   ;;  %s3285_s1 = inlined_call_operand.hbm [shape: bf16[256,256], index: 1, kind: input, shape index: {}]   ;;  %s3286_s2 = inlined_call_operand.hbm [shape: f32[1,256], index: 2, kind: input, shape index: {}]   ;;  %s3287_s3 = inlined_call_operand.hbm [shape: bf16[256,256], index: 3, kind: input, shape index: {}]   ;;  %s3288_s4 = inlined_call_operand.hbm [shape: f32[1,256], index: 4, kind: input, shape index: {}]   ;;  %s3289_s5 = inlined_call_operand.hbm [shape: bf16[256,256], index: 5, kind: input, shape index: {}]   ;;  %s3290_s6 = inlined_call_operand.hbm [shape: f32[1,256], index: 6, kind: input, shape index: {}]   ;;  %s3291_s7 = inlined_call_operand.hbm [shape: bf16[256,256], index: 7, kind: input, shape index: {}]   ;;  %s3292_s8 = inlined_call_operand.hbm [shape: f32[1,256], index: 8, kind: input, shape index: {}]   ;;  %s3293_s9 = inlined_call_operand.vmem [shape: f32[8,256], index: 9, kind: input, shape index: {}]   ;;  %s3294_s10 = inlined_call_operand.hbm [shape: f32[8,256], index: 10, kind: input, shape index: {}]   ;;  %s3295_s11 = inlined_call_operand.hbm [shape: f32[2,8,256], index: 11, kind: output, shape index: {}]  }
   0x1   :  { %3319 = sst [smem:[#allocation40_spill]] %s3284_s0 }
   0x2   :  { %3320 = sst [smem:[#allocation41_spill]] %s3285_s1 }
   0x3   :  { %3321 = sst [smem:[#allocation42_spill]] %s3286_s2 }
   0x4   :  { %3322 = sst [smem:[#allocation43_spill]] %s3287_s3 }
   0x5   :  { %3323 = sst [smem:[#allocation44_spill]] %s3288_s4 }
   0x6   :  { %3324 = sst [smem:[#allocation45_spill]] %s3289_s5 }
   0x7   :  { %3325 = sst [smem:[#allocation46_spill]] %s3290_s6 }
   0x8   :  { %3326 = sst [smem:[#allocation47_spill]] %s3291_s7 }
   0x9   :  { %3327 = sst [smem:[#allocation48_spill]] %s3292_s8 }
   0xa   :  { %3328 = sst [smem:[#allocation49_spill]] %s3293_s9 }
   0xb   :  { %3329 = sst [smem:[#allocation50_spill]] %s3294_s10 }
   0xc   :  { %3330 = sst [smem:[#allocation51_spill]] %s3295_s11 }
   0xd   :  { %16 = vsyncpa [#allocation4], 0 }
   0xe   :  { %18 = vsyncpa [#allocation4 + $0x1], 0 }
   0xf   :  { %19 = vsyncpa [#allocation7], 0 }
  0x10   :  { %21 = vsyncpa [#allocation7 + $0x1], 0 }
  0x11   :  { %22 = vsyncpa [#allocation10], 0 }
  0x12   :  { %24 = vsyncpa [#allocation10 + $0x1], 0 }
  0x13   :  { %25 = vsyncpa [#allocation13], 0 }
  0x14   :  { %27 = vsyncpa [#allocation13 + $0x1], 0 }
  0x15   :  { %28 = vsyncpa [#allocation16], 0 }
  0x16   :  { %30 = vsyncpa [#allocation16 + $0x1], 0 }
  0x17   :  { %31 = vsyncpa [#allocation19], 0 }
  0x18   :  { %33 = vsyncpa [#allocation19 + $0x1], 0 }
  0x19   :  { %34 = vsyncpa [#allocation5], 0 }
  0x1a   :  { %36 = vsyncpa [#allocation5 + $0x1], 0  ;;  %s2790_s17 = smov 0   ;;  %s2792_s18 = smov 0  }
  0x1b   :  { %s2794_s19 = smov 0   ;;  %s2796_s20 = smov 0  }
  0x1c   :  { %s2798_s21 = smov 0   ;;  %s2800_s22 = smov 0  }
  0x1d   :  { %s2802_s23 = smov 0   ;;  %s2804_s24 = smov 0  }
  0x1e   :  { %s2806_s25 = smov 0   ;;  %s2808_s26 = smov 0  }
  0x1f   :  { %s2810_s27 = smov 0  }
  0x20 LB: > { %3331 = sst [smem:[#allocation29_spill]] %s2673_s18  ;;  %s2844_s28 = sadd.s32 4294967295, %s2709_s27   ;;  %s2709_s27 = sphi %s2810_s27, %s42_s27   ;;  %s2705_s26 = sphi %s2808_s26, %s3393_s26   ;;  %s2701_s25 = sphi %s2806_s25, %s3400_s25   ;;  %s2697_s24 = sphi %s2804_s24, %s3391_s24   ;;  %s2693_s23 = sphi %s2802_s23, %s3399_s23   ;;  %s2689_s22 = sphi %s2800_s22, %s3398_s22   ;;  %s2685_s21 = sphi %s2798_s21, %s3397_s21   ;;  %s2681_s20 = sphi %s2796_s20, %s3396_s20   ;;  %s2677_s19 = sphi %s2794_s19, %s3395_s19   ;;  %s2673_s18 = sphi %s2792_s18, %s3394_s18   ;;  %s2669_s17 = sphi %s2790_s17, %s3389_s17  }
  0x21   : > { %3332 = sst [smem:[#allocation30_spill]] %s2681_s20  ;;  %s1852_s29 = sadd.s32 4294967294, %s2709_s27  }
  0x22   : > { %3333 = sst [smem:[#allocation31_spill]] %s2693_s23  ;;  %p3299_p0 = scmp.eq.s32.totalorder %s2709_s27, 0 }
  0x23   : > { %3334 = sst [smem:[#allocation32_spill]] %s2697_s24  ;;  %p74_p1 = scmp.ne.s32.totalorder %s2685_s21, %s2681_s20 }
  0x24   : > { %3335 = sst [smem:[#allocation33_spill]] %s2705_s26  ;;  %p3317_p2 = scmp.eq.s32.totalorder %s2844_s28, 0 }
  0x25   : > { %p94_p3 = scmp.ne.s32.totalorder %s2677_s19, %s2673_s18  ;;  %p100_p4 = scmp.ne.s32.totalorder %s2673_s18, %s2669_s17 }
  0x26   : > { %p2857_p5 = por %p3317_p2, %p74_p1  ;;  %p359_p9 = scmp.eq.s32.totalorder %s1852_s29, 3 }
  0x27   : > { %p2864_p7 = por %p94_p3, %p3299_p0  ;;  %p2870_p8 = por %p100_p4, %p3317_p2 }
  0x28   : > { %s3336_s12 = scalar_select %p2857_p5, 1, 0 }
  0x29   : > { %s3339_s14 = scalar_select %p2870_p8, 1, 0 }
  0x2a   : > { %3337 = sst [smem:[#allocation34_spill]] %s3336_s12  ;;  %p1853_p10 = scmp.ge.s32.totalorder %s2709_s27, 1 }
  0x2b   : > { %3340 = sst [smem:[#allocation35_spill]] %s3339_s14  ;;  %p366_p11 = scmp.lt.s32.totalorder %s2709_s27, 5 }
  0x2c   : > { %p2876_p12 = por %p359_p9, %p74_p1  ;;  %s2711_s17 = smov [#allocation17]  }
  0x2d   : > { %p2880_p13 = pnand %p1853_p10, %p366_p11  ;;  %s379_s30 = sshll.u32 %s2711_s17, 4  ;;  %s380_s30 = int_to_ptr.vmem [resolvable:$true] %s379_s30 }
  0x2e   : > { %s3341_s15 = scalar_select %p2876_p12, 1, 0 }
  0x2f   : > { %s3343_s16 = scalar_select %p2880_p13, 1, 0 }
  0x30   : > { %3342 = sst [smem:[#allocation36_spill]] %s3341_s15  ;;  %p2072_p3 = pneg %p2880_p13 }
  0x31   : > { %3344 = sst [smem:[#allocation37_spill]] %s3343_s16  ;;  %p2109_p4 = scmp.lt.s32.totalorder %s2709_s27, 4 }
  0x32   : > { %s2888_s20 = sand.u32 1, %s2677_s19   ;;  %p2073_p6 = pnand %p2072_p3, %p3317_p2 }
  0x33   : > { %p2896_p1 = pnand %p2109_p4, %p2864_p7  ;;  %s2901_s15 = sand.u32 1, %s2709_s27  }
  0x34   : > { %p2289_p9 = pneg %p2073_p6  ;;  %s2298_s11 = scalar_lea.vmem %s380_s30, 32 }
  0x35   : > { %p2299_p10 = scmp.ne.s32.totalorder %s380_s30, %s2298_s11  ;;  %p2306_p12 = scmp.lt.s32.totalorder %s380_s30, %s380_s30 }
  0x36   : > { %p2307_p8 = scmp.lt.s32.totalorder %s2298_s11, %s2298_s11 }
  0x37   : > { %p2301_p11 = pnand %p2299_p10, %p2289_p9 }
  0x38   : > { %p2308_p5 = por %p2307_p8, %p2306_p12 }
  0x39   : > { %p2302_p0 = pneg %p2301_p11 }
  0x3b   : > { %p2309_p13 = pnand %p2308_p5, %p2302_p0 }
  0x3d   : > { %2312 = shalt.err (!%p2309_p13)
}
  0x3e   : > { %s3346_s8 = sld [smem:[#allocation48_spill]]  ;;  %s2907_s13 = sshll.u32 %s2888_s20, 7 }
  0x3f   : > { %s2910_s9 = sshll.u32 %s2701_s25, 6  ;;  %s3347_s1 = sld [smem:[#allocation41_spill]] }
  0x40   : > { %s413_s18 = scalar_lea.vmem [#allocation6], %s2907_s13  ;;  %p2920_p0 = pneg %p2896_p1 }
  0x41   : > { %s419_s12 = sshll.u32 %s413_s18, 4  ;;  %s2712_s17 = smov [#allocation6]   ;;  %s420_s12 = int_to_ptr.vmem [resolvable:$true] %s419_s12 }
  0x44   : > { %2075 = dma.hbm_to_vmem [thread:$0]  (!%p2073_p6), %s3346_s8, 32, %s380_s30, [#allocation16]  }
  0x45   : > { %s418_s11 = scalar_lea.hbm %s3347_s1, %s2910_s9  ;;  %s2326_s30 = scalar_lea.vmem %s420_s12, 2048 }
  0x46   : > { %p2327_p5 = scmp.ne.s32.totalorder %s420_s12, %s2326_s30  ;;  %s2331_s8 = sshll.u32 %s2712_s17, 4  ;;  %s2332_s8 = int_to_ptr.vmem [resolvable:$false] %s2331_s8 }
  0x47   : > { %s2333_s23 = scalar_lea.vmem %s2332_s8, 4096  ;;  %p2334_p8 = scmp.lt.s32.totalorder %s420_s12, %s2332_s8 }
  0x48   : > { %p2329_p6 = pnand %p2327_p5, %p2920_p0  ;;  %p2335_p12 = scmp.lt.s32.totalorder %s2333_s23, %s2326_s30 }
  0x4a   : > { %p2330_p7 = pneg %p2329_p6  ;;  %p2336_p13 = por %p2335_p12, %p2334_p8 }
  0x4c   : > { %p2337_p3 = pnand %p2336_p13, %p2330_p7 }
  0x4e   : > { %2340 = shalt.err (!%p2337_p3)
}
  0x4f   : > { %s3311_s18 = smov 128   ;;  %s2714_s14 = smov 64  }
  0x50   : > { %s2715_s16 = smov 4   ;;  %s3349_s17 = scalar_lea.sflag [#allocation7], %s2901_s15 }
  0x51   : > { %2082 = dma.hbm_to_vmem [thread:$0]  (!%p2896_p1), %s418_s11, 2048, %s420_s12, %s3349_s17, %s3311_s18, %s2714_s14, %s2715_s16  }
  0x52   : > { %s3350_s3 = sld [smem:[#allocation43_spill]]  ;;  %s450_s1 = scalar_lea.vmem [#allocation9], %s2907_s13 }
  0x53   : > { %s456_s10 = sshll.u32 %s450_s1, 4  ;;  %s3313_s7 = scalar_lea.sflag [#allocation10], %s2901_s15  ;;  %s457_s10 = int_to_ptr.vmem [resolvable:$true] %s456_s10 }
  0x54   : > { %s2354_s6 = scalar_lea.vmem %s457_s10, 2048  ;;  %s2716_s4 = smov [#allocation9]  }
  0x55   : > { %p2355_p9 = scmp.ne.s32.totalorder %s457_s10, %s2354_s6  ;;  %s2359_s2 = sshll.u32 %s2716_s4, 4  ;;  %s2360_s2 = int_to_ptr.vmem [resolvable:$false] %s2359_s2 }
  0x56   : > { %s2361_s0 = scalar_lea.vmem %s2360_s2, 4096  ;;  %p2362_p5 = scmp.lt.s32.totalorder %s457_s10, %s2360_s2 }
  0x57   : > { %p2357_p10 = pnand %p2355_p9, %p2920_p0  ;;  %p2363_p6 = scmp.lt.s32.totalorder %s2361_s0, %s2354_s6 }
  0x58   : > { %s455_s23 = scalar_lea.hbm %s3350_s3, %s2910_s9 }
  0x59   : > { %p2358_p11 = pneg %p2357_p10  ;;  %p2364_p7 = por %p2363_p6, %p2362_p5 }
  0x5b   : > { %p2365_p8 = pnand %p2364_p7, %p2358_p11 }
  0x5d   : > { %2368 = shalt.err (!%p2365_p8)
}
  0x5e   : > { %2088 = dma.hbm_to_vmem [thread:$0]  (!%p2896_p1), %s455_s23, 2048, %s457_s10, %s3313_s7, %s3311_s18, %s2714_s14, %s2715_s16  }
  0x5f   : > { %s3351_s5 = sld [smem:[#allocation45_spill]]  ;;  %s487_s0 = scalar_lea.vmem [#allocation12], %s2907_s13 }
  0x60   : > { %s493_s6 = sshll.u32 %s487_s0, 4  ;;  %s3312_s12 = scalar_lea.sflag [#allocation13], %s2901_s15  ;;  %s494_s6 = int_to_ptr.vmem [resolvable:$true] %s493_s6 }
  0x61   : > { %s2382_s11 = scalar_lea.vmem %s494_s6, 2048  ;;  %s2717_s17 = smov [#allocation12]  }
  0x62   : > { %p2383_p12 = scmp.ne.s32.totalorder %s494_s6, %s2382_s11  ;;  %s2387_s8 = sshll.u32 %s2717_s17, 4  ;;  %s2388_s8 = int_to_ptr.vmem [resolvable:$false] %s2387_s8 }
  0x63   : > { %s2389_s30 = scalar_lea.vmem %s2388_s8, 4096  ;;  %p2390_p9 = scmp.lt.s32.totalorder %s494_s6, %s2388_s8 }
  0x64   : > { %p2385_p13 = pnand %p2383_p12, %p2920_p0  ;;  %p2391_p10 = scmp.lt.s32.totalorder %s2389_s30, %s2382_s11 }
  0x65   : > { %s492_s2 = scalar_lea.hbm %s3351_s5, %s2910_s9 }
  0x66   : > { %p2386_p3 = pneg %p2385_p13  ;;  %p2392_p11 = por %p2391_p10, %p2390_p9 }
  0x68   : > { %p2393_p5 = pnand %p2392_p11, %p2386_p3 }
  0x6a   : > { %2396 = shalt.err (!%p2393_p5)
}
  0x6b   : > { %2094 = dma.hbm_to_vmem [thread:$0]  (!%p2896_p1), %s492_s2, 2048, %s494_s6, %s3312_s12, %s3311_s18, %s2714_s14, %s2715_s16  }
  0x6c   : > { %s51_s9 = sadd.s32 1, %s2701_s25  ;;  %s54_s10 = sadd.s32 1, %s2705_s26 }
  0x6d   : > { %p52_p6 = scmp.ge.s32.totalorder %s51_s9, 2  ;;  %s61_s23 = sadd.s32 1, %s2689_s22 }
  0x6e   : > { %p68_p7 = scmp.ne.s32.totalorder %s2689_s22, %s2685_s21  ;;  %s390_s1 = sand.u32 1, %s2689_s22  }
  0x6f   : > { %s3402_s9 = smov (%p52_p6, %s51_s9), 0  ;;  %s3404_s10 = smov (!%p52_p6, %s54_s10), %s2705_s26 }
  0x70   : > { %3352 = sst [smem:[#allocation38_spill]] %s3402_s9  ;;  %p3353_p8 = scmp.eq.s32.totalorder %s2709_s27, 0 }
  0x71   : > { %s84_s16 = ssub.s32 %s2701_s25, %s3402_s9  ;;  %p56_p13 = scmp.ge.s32.totalorder %s3404_s10, 2 }
  0x72   : > { %p2974_p12 = por %p3353_p8, %p68_p7  ;;  %p85_p3 = scmp.eq.s32.totalorder %s84_s16, 0 }
  0x73   : > { %p3355_p9 = scmp.eq.s32.totalorder %s2844_s28, 3  ;;  %s3406_s10 = smov (%p56_p13, %s3404_s10), 0 }
  0x74   : > { %3357 = sst [smem:[#allocation39_spill]] %s3406_s10  ;;  %s3358_s2 = sadd.s32 1, %s2677_s19 }
  0x75   : > { %p2982_p10 = por %p3355_p9, %p68_p7  ;;  %s58_s6 = ssub.s32 %s2705_s26, %s3406_s10 }
  0x76   : > { %s2991_s0 = scalar_select %p85_p3, %s2677_s19, %s3358_s2  }
  0x77   : > { %s3356_s14 = scalar_select %p2982_p10, 1, 0 }
  0x78   : > { %s1856_s11 = sshll.u32 %s390_s1, 3  ;;  %p59_p11 = scmp.eq.s32.totalorder %s58_s6, 0 }
  0x79   : > { %s1962_s17 = sshll.u32 %s2705_s26, 7  ;;  %s394_s8 = scalar_lea.vmem [#allocation3], %s1856_s11 }
  0x7a   : > { %s402_s30 = sshll.u32 %s394_s8, 4  ;;  %s3359_s7 = sld [smem:[#allocation40_spill]]  ;;  %s403_s30 = int_to_ptr.vmem [resolvable:$true] %s402_s30 }
  0x7b   : > { %s2997_s18 = scalar_select %p59_p11, %s2689_s22, %s61_s23  }
  0x7c   : > { %p3006_p5 = pnand %p2109_p4, %p2974_p12  ;;  %s3011_s2 = sshll.u32 %s2701_s25, 4 }
  0x7d   : > { %s432_s6 = scalar_lea.vmem [#allocation8], %s2888_s20  ;;  %s3361_s10 = sld [smem:[#allocation42_spill]] }
  0x7e   : > { %s439_s11 = sshll.u32 %s432_s6, 4  ;;  %s391_s26 = scalar_lea.sflag [#allocation4], %s390_s1  ;;  %s440_s11 = int_to_ptr.vmem [resolvable:$true] %s439_s11 }
  0x7f   : > { %p2399_p6 = pneg %p3006_p5  ;;  %s2718_s12 = smov [#allocation3]  }
  0x80   : > { %s400_s3 = scalar_lea.hbm %s3359_s7, %s1962_s17  ;;  %s2410_s7 = scalar_lea.vmem %s403_s30, 128 }
  0x81   : > { %p2411_p7 = scmp.ne.s32.totalorder %s403_s30, %s2410_s7  ;;  %s2415_s4 = sshll.u32 %s2718_s12, 4  ;;  %s2416_s4 = int_to_ptr.vmem [resolvable:$false] %s2415_s4 }
  0x82   : > { %s2417_s17 = scalar_lea.vmem %s2416_s4, 256  ;;  %p2418_p12 = scmp.lt.s32.totalorder %s403_s30, %s2416_s4 }
  0x83   : > { %s437_s9 = scalar_lea.hbm %s3361_s10, %s3011_s2  ;;  %p2413_p8 = pnand %p2411_p7, %p2399_p6 }
  0x84   : > { %p2419_p13 = scmp.lt.s32.totalorder %s2417_s17, %s2410_s7 }
  0x85   : > { %p2414_p4 = pneg %p2413_p8 }
  0x86   : > { %p2420_p3 = por %p2419_p13, %p2418_p12 }
  0x88   : > { %p2421_p9 = pnand %p2420_p3, %p2414_p4 }
  0x8a   : > { %2424 = shalt.err (!%p2421_p9)
}
  0x8b   : > { %2079 = dma.hbm_to_vmem [thread:$0]  (!%p3006_p5), %s400_s3, 128, %s403_s30, %s391_s26  }
  0x8c   : > { %s2438_s1 = scalar_lea.vmem %s440_s11, 16  ;;  %s2719_s16 = smov [#allocation8]  }
  0x8d   : > { %p2439_p11 = scmp.ne.s32.totalorder %s440_s11, %s2438_s1  ;;  %s2443_s6 = sshll.u32 %s2719_s16, 4  ;;  %s2444_s6 = int_to_ptr.vmem [resolvable:$false] %s2443_s6 }
  0x8e   : > { %s2445_s8 = scalar_lea.vmem %s2444_s6, 32  ;;  %p2446_p7 = scmp.lt.s32.totalorder %s440_s11, %s2444_s6 }
  0x8f   : > { %p2441_p2 = pnand %p2439_p11, %p2920_p0  ;;  %p2447_p8 = scmp.lt.s32.totalorder %s2445_s8, %s2438_s1 }
  0x91   : > { %p2442_p6 = pneg %p2441_p2  ;;  %p2448_p10 = por %p2447_p8, %p2446_p7 }
  0x93   : > { %p2449_p12 = pnand %p2448_p10, %p2442_p6 }
  0x95   : > { %2452 = shalt.err (!%p2449_p12)
}
  0x96   : > { %s3362_s5 = scalar_lea.sflag [#allocation7], %s2901_s15  ;;  %s3363_s7 = sld [smem:[#allocation44_spill]] }
  0x97   : > { %2085 = dma.hbm_to_vmem [thread:$0]  (!%p2896_p1), %s437_s9, 16, %s440_s11, %s3362_s5  }
  0x98   : > { %s469_s4 = scalar_lea.vmem [#allocation11], %s2888_s20  ;;  %s2720_s16 = smov [#allocation11]  }
  0x99   : > { %s476_s17 = sshll.u32 %s469_s4, 4  ;;  %s2471_s6 = sshll.u32 %s2720_s16, 4  ;;  %s477_s17 = int_to_ptr.vmem [resolvable:$true] %s476_s17  ;;  %s2472_s6 = int_to_ptr.vmem [resolvable:$false] %s2471_s6 }
  0x9a   : > { %s2466_s1 = scalar_lea.vmem %s477_s17, 16  ;;  %s2473_s8 = scalar_lea.vmem %s2472_s6, 32 }
  0x9b   : > { %p2467_p2 = scmp.ne.s32.totalorder %s477_s17, %s2466_s1  ;;  %p2474_p4 = scmp.lt.s32.totalorder %s477_s17, %s2472_s6 }
  0x9c   : > { %s474_s12 = scalar_lea.hbm %s3363_s7, %s3011_s2  ;;  %p2475_p13 = scmp.lt.s32.totalorder %s2473_s8, %s2466_s1 }
  0x9d   : > { %p2469_p10 = pnand %p2467_p2, %p2920_p0 }
  0x9e   : > { %p2476_p3 = por %p2475_p13, %p2474_p4 }
  0x9f   : > { %p2470_p5 = pneg %p2469_p10 }
  0xa1   : > { %p2477_p9 = pnand %p2476_p3, %p2470_p5 }
  0xa3   : > { %2480 = shalt.err (!%p2477_p9)
}
  0xa4   : > { %s3364_s9 = scalar_lea.sflag [#allocation10], %s2901_s15  ;;  %s3365_s3 = sld [smem:[#allocation46_spill]] }
  0xa5   : > { %2091 = dma.hbm_to_vmem [thread:$0]  (!%p2896_p1), %s474_s12, 16, %s477_s17, %s3364_s9  }
  0xa6   : > { %s506_s30 = scalar_lea.vmem [#allocation14], %s2888_s20  ;;  %s2721_s4 = smov [#allocation14]  }
  0xa7   : > { %s513_s23 = sshll.u32 %s506_s30, 4  ;;  %s2499_s1 = sshll.u32 %s2721_s4, 4  ;;  %s514_s23 = int_to_ptr.vmem [resolvable:$true] %s513_s23  ;;  %s2500_s1 = int_to_ptr.vmem [resolvable:$false] %s2499_s1 }
  0xa8   : > { %s2494_s7 = scalar_lea.vmem %s514_s23, 16  ;;  %s2501_s16 = scalar_lea.vmem %s2500_s1, 32 }
  0xa9   : > { %p2495_p11 = scmp.ne.s32.totalorder %s514_s23, %s2494_s7  ;;  %p2502_p8 = scmp.lt.s32.totalorder %s514_s23, %s2500_s1 }
  0xaa   : > { %s511_s26 = scalar_lea.hbm %s3365_s3, %s3011_s2  ;;  %p2503_p12 = scmp.lt.s32.totalorder %s2501_s16, %s2494_s7 }
  0xab   : > { %p2497_p6 = pnand %p2495_p11, %p2920_p0 }
  0xac   : > { %p2504_p2 = por %p2503_p12, %p2502_p8 }
  0xad   : > { %p2498_p7 = pneg %p2497_p6 }
  0xaf   : > { %p2505_p10 = pnand %p2504_p2, %p2498_p7 }
  0xb1   : > { %2508 = shalt.err (!%p2505_p10)
}
  0xb2   : > { %s3366_s2 = scalar_lea.sflag [#allocation13], %s2901_s15  ;;  %s1964_s12 = sshll.u32 %s2701_s25, 11 }
  0xb3   : > { %2097 = dma.hbm_to_vmem [thread:$0]  (!%p2896_p1), %s511_s26, 16, %s514_s23, %s3366_s2  }
  0xb4   : > { %s3367_s8 = sld [smem:[#allocation47_spill]]  ;;  %s524_s11 = scalar_lea.vmem [#allocation15], %s2907_s13 }
  0xb5   : > { %s532_s5 = sshll.u32 %s524_s11, 4  ;;  %s521_s3 = scalar_lea.sflag [#allocation16], %s2901_s15  ;;  %s533_s5 = int_to_ptr.vmem [resolvable:$true] %s532_s5 }
  0xb6   : > { %s2522_s30 = scalar_lea.vmem %s533_s5, 2048  ;;  %s2722_s7 = smov [#allocation15]  }
  0xb7   : > { %p2523_p5 = scmp.ne.s32.totalorder %s533_s5, %s2522_s30  ;;  %s2527_s4 = sshll.u32 %s2722_s7, 4  ;;  %s2528_s4 = int_to_ptr.vmem [resolvable:$false] %s2527_s4 }
  0xb8   : > { %s2529_s1 = scalar_lea.vmem %s2528_s4, 4096  ;;  %p2530_p3 = scmp.lt.s32.totalorder %s533_s5, %s2528_s4 }
  0xb9   : > { %p2525_p4 = pnand %p2523_p5, %p2920_p0  ;;  %p2531_p9 = scmp.lt.s32.totalorder %s2529_s1, %s2522_s30 }
  0xba   : > { %s531_s9 = scalar_lea.hbm %s3367_s8, %s1964_s12 }
  0xbb   : > { %p2526_p13 = pneg %p2525_p4  ;;  %p2532_p11 = por %p2531_p9, %p2530_p3 }
  0xbd   : > { %p2533_p6 = pnand %p2532_p11, %p2526_p13 }
  0xbf   : > { %2536 = shalt.err (!%p2533_p6)
}
  0xc0   : > { %s2723_s26 = smov 8   ;;  %s3368_s13 = smov 128  }
  0xc1   : > { %2100 = dma.hbm_to_vmem [thread:$0]  (!%p2896_p1), %s531_s9, 2048, %s533_s5, %s521_s3, %s3368_s13, %s3368_s13, %s2723_s26  }
  0xc2   : > { %s1872_s15 = sshll.u32 %s2888_s20, 3  ;;  %s1873_s23 = sshll.u32 %s2701_s25, 7 }
  0xc3   : > { %s3369_s12 = sld [smem:[#allocation50_spill]]  ;;  %s553_s6 = scalar_lea.vmem [#allocation18], %s1872_s15 }
  0xc4   : > { %s560_s8 = sshll.u32 %s553_s6, 4  ;;  %s550_s11 = scalar_lea.sflag [#allocation19], %s2888_s20  ;;  %s561_s8 = int_to_ptr.vmem [resolvable:$true] %s560_s8 }
  0xc5   : > { %s2550_s30 = scalar_lea.vmem %s561_s8, 128  ;;  %s2724_s7 = smov [#allocation18]  }
  0xc6   : > { %p2551_p7 = scmp.ne.s32.totalorder %s561_s8, %s2550_s30  ;;  %s2555_s4 = sshll.u32 %s2724_s7, 4  ;;  %s2556_s4 = int_to_ptr.vmem [resolvable:$false] %s2555_s4 }
  0xc7   : > { %s2557_s1 = scalar_lea.vmem %s2556_s4, 256  ;;  %p2558_p2 = scmp.lt.s32.totalorder %s561_s8, %s2556_s4 }
  0xc8   : > { %p2553_p8 = pnand %p2551_p7, %p2920_p0  ;;  %p2559_p10 = scmp.lt.s32.totalorder %s2557_s1, %s2550_s30 }
  0xc9   : > { %s558_s17 = scalar_lea.hbm %s3369_s12, %s1873_s23 }
  0xca   : > { %p2554_p12 = pneg %p2553_p8  ;;  %p2560_p5 = por %p2559_p10, %p2558_p2 }
  0xcc   : > { %p2561_p4 = pnand %p2560_p5, %p2554_p12 }
  0xce   : > { %2564 = shalt.err (!%p2561_p4)
}
  0xcf   : > { %2103 = dma.hbm_to_vmem [thread:$0]  (!%p2896_p1), %s558_s17, 128, %s561_s8, %s550_s11  }
  0xd0   : > { %s3370_s9 = sld [smem:[#allocation37_spill]] }
  0xd6   : > { %p3371_p13 = scmp.ne.s32.totalorder %s3370_s9, 0 }
  0xd7   : > { %s3372_s20 = sld [smem:[#allocation34_spill]] (!%p3371_p13)  ;;  %s3080_s24 = sand.u32 (!%p3371_p13), 1, %s2685_s21  }
  0xd8   : > { %569 = sbr.rel (%p3371_p13) target bundleno = 1576 (0x628), region = 64  ;;  %s1875_s5 = sshll.u32 (!%p3371_p13), %s3080_s24, 3 }
  0xd9   : > { %s572_s3 = scalar_lea.sflag (!%p3371_p13), [#allocation4], %s3080_s24  ;;  %s3084_s26 = scalar_lea.vmem (!%p3371_p13), [#allocation3], %s1875_s5 }
  0xdd   : > { %p3373_p0 = scmp.ne.s32.totalorder %s3372_s20, 0 }
  0xdf   : > { %2636 = dma.done.wait (%p3373_p0), %s572_s3, 128  }
  0xe0   : > { %2638 = vsyncadd (%p3373_p0), %s572_s3, 4294967168  ;;  %s3374_s29 = sld [smem:[#allocation29_spill]]  ;;  %s580_s15 = sand.u32 1, %s2844_s28  }
  0xe1   : > { %s3375_s13 = sld [smem:[#allocation35_spill]]  ;;  %s581_s2 = scalar_lea.sflag [#allocation7], %s580_s15 }
  0xe6   : > { %s3092_s23 = sand.u32 1, %s3374_s29  }
  0xe7   : > { %s1876_s16 = sshll.u32 %s3092_s23, 7  ;;  %p3376_p1 = scmp.ne.s32.totalorder %s3375_s13, 0 }
  0xe8   : > { %s3095_s12 = scalar_lea.vmem [#allocation6], %s1876_s16 }
  0xe9   : > { %2640 = dma.done.wait (%p3376_p1), %s581_s2, 2064  }
  0xea   : > { %2642 = vsyncadd (%p3376_p1), %s581_s2, 4294965232  ;;  %s592_s17 = scalar_lea.vmem [#allocation8], %s3092_s23  ;;  %s598_s6 = scalar_lea.sflag [#allocation10], %s580_s15 }
  0xeb   : > { %s3102_s8 = scalar_lea.vmem [#allocation9], %s1876_s16 }
  0xec   : > { %2644 = dma.done.wait (%p3376_p1), %s598_s6, 2064  }
  0xed   : > { %2646 = vsyncadd (%p3376_p1), %s598_s6, 4294965232  ;;  %s609_s11 = scalar_lea.vmem [#allocation11], %s3092_s23  ;;  %s615_s30 = scalar_lea.sflag [#allocation13], %s580_s15 }
  0xee   : > { %s3109_s7 = scalar_lea.vmem [#allocation12], %s1876_s16 }
  0xef   : > { %2648 = dma.done.wait (%p3376_p1), %s615_s30, 2064  }
  0xf0   : > { %2650 = vsyncadd (%p3376_p1), %s615_s30, 4294965232  ;;  %s626_s4 = scalar_lea.vmem [#allocation14], %s3092_s23  ;;  %s632_s1 = scalar_lea.sflag [#allocation16], %s580_s15 }
  0xf1   : > { %s3116_s9 = scalar_lea.vmem [#allocation15], %s1876_s16 }
  0xf2   : > { %2652 = dma.done.wait (%p3376_p1), %s632_s1, 2048  }
  0xf3   : > { %2654 = vsyncadd (%p3376_p1), %s632_s1, 4294965248  ;;  %p3377_p3 = scmp.eq.s32.totalorder %s2844_s28, 0 }
  0xf5   : > { %2656 = dma.done.wait (%p3377_p3), [#allocation16], 32   ;;  %p3378_p9 = pmov %p3377_p3 }
  0xf6   : > { %s1881_s20 = sshll.u32 %s3092_s23, 3  ;;  %s645_s5 = scalar_lea.sflag [#allocation19], %s3092_s23 }
  0xf7   : > { %2658 = vsyncadd (%p3378_p9), [#allocation16], 4294967264  ;;  %s3128_s3 = scalar_lea.vmem [#allocation18], %s1881_s20 }
  0xf8   : > { %2660 = dma.done.wait (%p3376_p1), %s645_s5, 128  }
  0xf9   : > { %2662 = vsyncadd (%p3376_p1), %s645_s5, 4294967168  ;;  %s1882_s28 = sshll.u32 %s3080_s24, 4  ;;  %v2209_v0 = vld [vmem:[%s3102_s8 + $0x78] sm:$0xff]   ;;  %v2213_v4 = vld [vmem:[%s3102_s8 + $0x70] sm:$0xff]   ;;  %v2725_v51 = vmov 0.0   ;;  %vm2726_vm0 = vmmov 0  }
  0xfa   : > { %v2210_v1 = vld [vmem:[%s3102_s8 + $0x38] sm:$0xff]   ;;  %1988 = vmatprep.subr.bf16.mxu1 %v2209_v0  ;;  %v2214_v5 = vld [vmem:[%s3102_s8 + $0x30] sm:$0xff]   ;;  %v2217_v8 = vld [vmem:[%s3102_s8 + $0x68] sm:$0xff]   ;;  %s2727_s29 = smov 64   ;;  %vm1348_vm1 = vcmask 1043456   ;;  %vm1331_vm3 = vcmask 64512  }
  0xfb   : > { %v2211_v2 = vld [vmem:[%s3095_s12 + $0x78] sm:$0xff]   ;;  %1989 = vmatpush3.bf16.msra.mxu1 %v2210_v1  ;;  %v2215_v6 = vld [vmem:[%s3095_s12 + $0x70] sm:$0xff]   ;;  %v2219_v10 = vld [vmem:[%s3095_s12 + $0x68] sm:$0xff]   ;;  %s3220_s23 = scalar_lea.vmem [#allocation20], %s1882_s28 }
  0xfc   : > { %v2212_v3 = vld [vmem:[%s3095_s12 + $0x38] sm:$0xff]   ;;  %1966 = vmatprep.subr.bf16.mxu0 %v2211_v2  ;;  %1990 = vmatprep.subr.bf16.mxu1 %v2213_v4  ;;  %v2216_v7 = vld [vmem:[%s3095_s12 + $0x30] sm:$0xff]   ;;  %v2220_v11 = vld [vmem:[%s3095_s12 + $0x28] sm:$0xff]  }
  0xfd   : > { %1967 = vmatpush3.bf16.msra.mxu0 %v2212_v3  ;;  %v2218_v9 = vld [vmem:[%s3102_s8 + $0x28] sm:$0xff]   ;;  %v2221_v12 = vld [vmem:[%s3102_s8 + $0x60] sm:$0xff]   ;;  %v2225_v16 = vld [vmem:[%s3102_s8 + $0x58] sm:$0xff]  }
  0xfe   : > { %1968 = vmatprep.subr.bf16.mxu0 %v2215_v6  ;;  %v2222_v13 = vld [vmem:[%s3102_s8 + $0x20] sm:$0xff]   ;;  %v2226_v17 = vld [vmem:[%s3102_s8 + $0x18] sm:$0xff]   ;;  %v2229_v20 = vld [vmem:[%s3102_s8 + $0x50] sm:$0xff]  }
  0xff   : > { %1991 = vmatpush3.bf16.msra.mxu1 %v2214_v5  ;;  %v2223_v14 = vld [vmem:[%s3095_s12 + $0x60] sm:$0xff]   ;;  %v2227_v18 = vld [vmem:[%s3095_s12 + $0x58] sm:$0xff]   ;;  %v2231_v22 = vld [vmem:[%s3095_s12 + $0x50] sm:$0xff]  }
 0x100   : > { %1992 = vmatprep.subr.bf16.mxu1 %v2217_v8  ;;  %v2224_v15 = vld [vmem:[%s3095_s12 + $0x20] sm:$0xff]   ;;  %v2228_v19 = vld [vmem:[%s3095_s12 + $0x18] sm:$0xff]   ;;  %v2232_v23 = vld [vmem:[%s3095_s12 + $0x10] sm:$0xff]  }
 0x101   : > { %1969 = vmatpush3.bf16.msra.mxu0 %v2216_v7  ;;  %v2230_v21 = vld [vmem:[%s3102_s8 + $0x10] sm:$0xff]   ;;  %v2233_v24 = vld [vmem:[%s3102_s8 + $0x48] sm:$0xff]   ;;  %v2237_v28 = vld [vmem:[%s3102_s8 + $0x40] sm:$0xff]  }
 0x102   : > { %1970 = vmatprep.subr.bf16.mxu0 %v2219_v10  ;;  %v2234_v25 = vld [vmem:[%s3102_s8 + $0x8] sm:$0xff]   ;;  %v2238_v29 = vld [vmem:[%s3102_s8] sm:$0xff]   ;;  %v2245_v37 = vld [vmem:[%s3109_s7 + $0x70] sm:$0xff]  }
 0x103   : > { %1993 = vmatpush3.bf16.msra.mxu1 %v2218_v9  ;;  %v2235_v26 = vld [vmem:[%s3095_s12 + $0x48] sm:$0xff]   ;;  %v2239_v30 = vld [vmem:[%s3095_s12 + $0x40] sm:$0xff]   ;;  %v734_v32 = vld [vmem:[%s3084_s26] sm:$0xff]  ;;  %s3379_s26 = sld [smem:[#allocation31_spill]] }
 0x104   : > { %1994 = vmatprep.subr.bf16.mxu1 %v2221_v12  ;;  %v2236_v27 = vld [vmem:[%s3095_s12 + $0x8] sm:$0xff]   ;;  %v2240_v31 = vld [vmem:[%s3095_s12] sm:$0xff]   ;;  %v1886_v33 = vcombine.high %v734_v32, %v734_v32  ;;  %v1885_v34 = vcombine.low %v734_v32, %v734_v32  ;;  %v2246_v38 = vld [vmem:[%s3109_s7 + $0x30] sm:$0xff]   ;;  %s3380_s12 = sld [smem:[#allocation49_spill]] }
 0x105   : > { %1971 = vmatpush3.bf16.msra.mxu0 %v2220_v11  ;;  %v2243_v35 = vld [vmem:[%s3109_s7 + $0x78] sm:$0xff]   ;;  %v2247_v39 = vld [vmem:[%s3109_s7 + $0x68] sm:$0xff]   ;;  %v2249_v41 = vld [vmem:[%s3109_s7 + $0x60] sm:$0xff]  }
 0x106   : > { %1972 = vmatprep.subr.bf16.mxu0 %v2223_v14  ;;  %1086 = vmatprep.mubr.bf16.mxu1 %v1886_v33  ;;  %v2244_v36 = vld [vmem:[%s3109_s7 + $0x38] sm:$0xff]   ;;  %v2248_v40 = vld [vmem:[%s3109_s7 + $0x28] sm:$0xff]   ;;  %v2250_v42 = vld [vmem:[%s3109_s7 + $0x20] sm:$0xff]  }
 0x107   : > { %1995 = vmatpush3.bf16.msra.mxu1 %v2222_v13  ;;  %911 = vmatprep.mubr.bf16.mxu0 %v1886_v33  ;;  %v2251_v43 = vld [vmem:[%s3109_s7 + $0x58] sm:$0xff]   ;;  %v2253_v45 = vld [vmem:[%s3109_s7 + $0x50] sm:$0xff]   ;;  %v2255_v47 = vld [vmem:[%s3109_s7 + $0x48] sm:$0xff]  }
 0x108   : > { %1996 = vmatprep.subr.bf16.mxu1 %v2225_v16  ;;  %v2252_v44 = vld [vmem:[%s3109_s7 + $0x18] sm:$0xff]   ;;  %v2254_v46 = vld [vmem:[%s3109_s7 + $0x10] sm:$0xff]   ;;  %v2256_v48 = vld [vmem:[%s3109_s7 + $0x8] sm:$0xff]  }
 0x109   : > { %1973 = vmatpush3.bf16.msra.mxu0 %v2224_v15  ;;  %v2257_v49 = vld [vmem:[%s3109_s7 + $0x40] sm:$0xff]   ;;  %v1903_v56 = vld [vmem:[%s609_s11] ss:$0 sm:$0xff]  ;;  %p729_p11 = scmp.lt.s32.totalorder %s3379_s26, 1  ;;  %p1954_p6 = scmp.ne.s32.totalorder %s3379_s26, 0 }
 0x10a   : > { %1974 = vmatprep.subr.bf16.mxu0 %v2227_v18  ;;  %v2258_v50 = vld [vmem:[%s3109_s7] sm:$0xff]   ;;  %v1884_v59 = vld [vmem:[%s592_s17] ss:$0 sm:$0xff] }
 0x10b   : > { %1997 = vmatpush3.bf16.msra.mxu1 %v2226_v17  ;;  %s730_s13 = scalar_select %p729_p11, %s3379_s26, 1  ;;  %v736_v8 = vld [vmem:[%s3128_s3] sm:$0xff] }
 0x10c   : > { %1998 = vmatprep.subr.bf16.mxu1 %v2229_v20 }
 0x10d   : > { %1975 = vmatpush3.bf16.msra.mxu0 %v2228_v19  ;;  %s1883_s15 = sshll.u32 %s730_s13, 3  ;;  %v1920_v19 = vld [vmem:[%s626_s4] ss:$0 sm:$0xff] }
 0x10e   : > { %1976 = vmatprep.subr.bf16.mxu0 %v2231_v22  ;;  %s732_s17 = scalar_lea.vmem %s3380_s12, %s1883_s15 }
 0x10f   : > { %1999 = vmatpush3.bf16.msra.mxu1 %v2230_v21  ;;  %v735_v7 = vld [vmem:[%s732_s17] sm:$0xff] }
 0x110   : > { %2000 = vmatprep.subr.bf16.mxu1 %v2233_v24 }
 0x111   : > { %1977 = vmatpush3.bf16.msra.mxu0 %v2232_v23  ;;  %v1325_v23 = vlaneseq }
 0x112   : > { %1978 = vmatprep.subr.bf16.mxu0 %v2235_v26 }
 0x113   : > { %2001 = vmatpush3.bf16.msra.mxu1 %v2234_v25  ;;  %v3196_v24 = vshrl.u32 %v1325_v23, 7  ;;  %v1328_v25 = vand.u32 127, %v1325_v23 }
 0x114   : > { %2002 = vmatprep.subr.bf16.mxu1 %v2237_v28 }
 0x115   : > { %1979 = vmatpush3.bf16.msra.mxu0 %v2236_v27  ;;  %vm1329_vm2 = vcmp.le.s32.totalorder %v1328_v25, %v3196_v24 }
 0x116   : > { %1980 = vmatprep.subr.bf16.mxu0 %v2239_v30 }
 0x117   : > { %2003 = vmatpush3.bf16.msra.mxu1 %v2238_v29 }
 0x118   : > { %2042 = vmatprep.subr.bf16.mxu1 %v2725_v51 }
 0x119   : > { %1981 = vmatpush3.bf16.msra.mxu0 %v2240_v31 }
 0x11a   : > { %1087 = vmatmul.mubr.bf16.vlgmr.msra.gmra.mxu1 %v1885_v34  ;;  %2010 = vmatprep.subr.bf16.mxu0 %v2243_v35 }
 0x11b   : > { %2044 = vmatprep.mubr.msk.bf16.mxu1 %vm2726_vm0, %v2725_v51 }
 0x11c   : > { %912 = vmatmul.mubr.bf16.vlgmr.msra.gmra.mxu0 %v1885_v34 }
 0x11d   : > { %1261 = vmatprep.mubr.bf16.mxu0 %v1886_v33  ;;  %2011 = vmatpush3.bf16.msra.mxu0 %v2244_v36 }
 0x11e   : > { %2012 = vmatprep.subr.bf16.mxu0 %v2245_v37  ;;  %v2261_v37 = vld [vmem:[%s3116_s9 + $0x74] ss:$8 sps:$4 sm:$0xff]  }
 0x121   : > { %2013 = vmatpush3.bf16.msra.mxu0 %v2246_v38 }
 0x122   : > { %2014 = vmatprep.subr.bf16.mxu0 %v2247_v39 }
 0x125   : > { %2015 = vmatpush3.bf16.msra.mxu0 %v2248_v40 }
 0x126   : > { %2016 = vmatprep.subr.bf16.mxu0 %v2249_v41  ;;  %v2259_v41 = vld [vmem:[%s3116_s9 + $0x70] ss:$8 sps:$4 sm:$0xff]  }
 0x129   : > { %2017 = vmatpush3.bf16.msra.mxu0 %v2250_v42 }
 0x12a   : > { %2018 = vmatprep.subr.bf16.mxu0 %v2251_v43  ;;  %v2264_v43 = vld [vmem:[%s3116_s9 + $0x64] ss:$8 sps:$4 sm:$0xff]  }
 0x12d   : > { %2019 = vmatpush3.bf16.msra.mxu0 %v2252_v44  ;;  %v2262_v44 = vld [vmem:[%s3116_s9 + $0x60] ss:$8 sps:$4 sm:$0xff]  }
 0x12e   : > { %2020 = vmatprep.subr.bf16.mxu0 %v2253_v45  ;;  %v2267_v45 = vld [vmem:[%s3116_s9 + $0x54] ss:$8 sps:$4 sm:$0xff]  }
 0x131   : > { %2021 = vmatpush3.bf16.msra.mxu0 %v2254_v46  ;;  %v2265_v46 = vld [vmem:[%s3116_s9 + $0x50] ss:$8 sps:$4 sm:$0xff]  }
 0x132   : > { %2022 = vmatprep.subr.bf16.mxu0 %v2255_v47  ;;  %v2270_v47 = vld [vmem:[%s3116_s9 + $0x44] ss:$8 sps:$4 sm:$0xff]  }
 0x135   : > { %2023 = vmatpush3.bf16.msra.mxu0 %v2256_v48  ;;  %v2268_v48 = vld [vmem:[%s3116_s9 + $0x40] ss:$8 sps:$4 sm:$0xff]  }
 0x136   : > { %2024 = vmatprep.subr.bf16.mxu0 %v2257_v49  ;;  %v2273_v49 = vld [vmem:[%s3116_s9 + $0x34] ss:$8 sps:$4 sm:$0xff]  }
 0x139   : > { %2025 = vmatpush3.bf16.msra.mxu0 %v2258_v50  ;;  %v2271_v50 = vld [vmem:[%s3116_s9 + $0x30] ss:$8 sps:$4 sm:$0xff]  }
 0x13a   : > { %2036 = vmatprep.subr.bf16.mxu0 %v2725_v51 }
 0x13c   : > { %1262 = vmatmul.mubr.bf16.vlgmr.msra.gmra.mxu0 %v1885_v34 }
 0x13d   : > { %2038 = vmatprep.mubr.msk.bf16.mxu0 %vm2726_vm0, %v2725_v51  ;;  %v2276_v51 = vld [vmem:[%s3116_s9 + $0x24] ss:$8 sps:$4 sm:$0xff]  }
 0x1da   : > { %v2004_v52 = vpop.f32.mrf.mxu1 }
 0x1dc   : > { %v1982_v53 = vpop.f32.mrf.mxu0  ;;  %v2005_v54 = vpop.f32.mrf.mxu1 }
 0x1dd   : > { %v2006_v57 = vadd.f32 %v2005_v54, %v2004_v52  ;;  %v2274_v52 = vld [vmem:[%s3116_s9 + $0x20] ss:$8 sps:$4 sm:$0xff]   ;;  %v2277_v54 = vld [vmem:[%s3116_s9 + $0x10] ss:$8 sps:$4 sm:$0xff]  }
 0x1de   : > { %v1983_v55 = vpop.f32.mrf.mxu0  ;;  %v2007_v60 = vpop.f32.mrf.mxu1 }
 0x1df   : > { %v1984_v58 = vadd.f32 %v1983_v55, %v1982_v53  ;;  %v1089_v62 = vadd.f32 %v2006_v57, %v1903_v56  ;;  %v2279_v53 = vld [vmem:[%s3116_s9 + $0x14] ss:$8 sps:$4 sm:$0xff]   ;;  %v2282_v55 = vld [vmem:[%s3116_s9 + $0x4] ss:$8 sps:$4 sm:$0xff]   ;;  %v2280_v56 = vld [vmem:[%s3116_s9] ss:$8 sps:$4 sm:$0xff]  }
 0x1e0   : > { %v1985_v61 = vpop.f32.mrf.mxu0  ;;  %v2008_v63 = vpop.f32.mrf.mxu1  ;;  %v2728_v57 = vmov 0  }
 0x1e1   : > { %v914_v1 = vadd.f32 %v1984_v58, %v1884_v59  ;;  %1277 = vrot.lane.b32.xlu0 %v1089_v62, %s2727_s29  ;;  %v1280_v10 = vmul.f32 %v1089_v62, %v735_v7 }
 0x1e2   : > { %v1986_v0 = vpop.f32.mrf.mxu0 }
 0x1e3   : > { %v1273_v16 = vmul.f32 %v914_v1, %v735_v7 }
 0x1e5   : > { %1270 = vrot.lane.b32.xlu0 %v914_v1, %s2727_s29 }
 0x1fc   : > { %v2026_v2 = vpop.f32.mrf.mxu0 }
 0x1fe   : > { %v2027_v3 = vpop.f32.mrf.mxu0 }
 0x1ff   : > { %v2028_v4 = vadd.f32 %v2027_v3, %v2026_v2 }
 0x200   : > { %v2029_v5 = vpop.f32.mrf.mxu0 }
 0x201   : > { %v1264_v20 = vadd.f32 %v2028_v4, %v1920_v19 }
 0x202   : > { %v2030_v6 = vpop.f32.mrf.mxu0 }
 0x203   : > { %v1344_v21 = vpack.c.bf16 %v1264_v20, %v1264_v20 }
 0x205   : > { %v1350_v22 = vsel %vm1348_vm1, %v1344_v21, 0 }
 0x206   : > { %2043 = vmatpush3.bf16.msra.mxu1 %v1350_v22 }
 0x207   : > { %1489 = vmatprep.subr.bf16.mxu1 %v2261_v37 }
 0x253   : > { %v1278_v9 = vpop.permute.xlu0 %1277 }
 0x254   : > { %v1281_v11 = vmul.f32 %v1278_v9, %v736_v8 }
 0x256   : > { %v1282_v12 = vadd.f32 %v1281_v11, %v1280_v10 }
 0x257   : > { %v1271_v13 = vpop.permute.xlu0 %1270 }
 0x258   : > { %v1284_v14 = vpack.c.bf16 %v1282_v12, %v1282_v12  ;;  %v1274_v15 = vmul.f32 %v1271_v13, %v736_v8 }
 0x25a   : > { %2037 = vmatpush3.bf16.xpose.msra.mxu0 %v1284_v14  ;;  %v1275_v17 = vadd.f32 %v1274_v15, %v1273_v16 }
 0x25c   : > { %v1283_v18 = vpack.c.bf16 %v1275_v17, %v1275_v17 }
 0x261   : > { %2039 = vmatmul.mubr.bf16.vlgmr.msra.gmra.mxu0 %v1283_v18 }
 0x321   : > { %v1319_v26 = vpop.f32.mrf.mxu0 }
 0x322   : > { %v1330_v27 = vsel %vm1329_vm2, %v1319_v26, -1e+30 }
 0x323   : > { %v2040_v28 = vpop.f32.mrf.mxu0  ;;  %v1332_v29 = vsel %vm1331_vm3, %v1330_v27, -inf }
 0x324   : > { %1333 = vmax.xlane.f32.xlu1 %v1332_v29 }
 0x325   : > { %v1322_v30 = vpop.f32.mrf.mxu0 }
 0x327   : > { %v2041_v31 = vpop.f32.mrf.mxu0 }
 0x3ad   : > { %v1334_v32 = vpop.xlane.xlu1 %1333 }
 0x3ae   : > { %v1335_v33 = vsub.f32 %v1330_v27, %v1334_v32 }
 0x3b0   : > { %v1336_v34 = vmul.f32 1.442695, %v1335_v33 }
 0x3b2   : > { %2283 = vpow2.f32 %v1336_v34 }
 0x3bf   : > { %v2284_v35 = vpop.eup %2283 }
 0x3c0   : > { %v1338_v36 = vsel %vm1331_vm3, %v2284_v35, 0.0 }
 0x3c1   : > { %1339 = vadd.xlane.f32.xlu1 %v1338_v36 }
 0x44a   : > { %v1340_v38 = vpop.xlane.xlu1 %1339 }
 0x44b   : > { %2285 = vrcp.f32 %v1340_v38 }
 0x458   : > { %v2286_v39 = vpop.eup %2285 }
 0x459   : > { %v1342_v40 = vmul.f32 %v2286_v39, %v2284_v35 }
 0x45b   : > { %v1343_v42 = vpack.c.bf16 %v1342_v40, %v1342_v40 }
 0x45d   : > { %2045 = vmatmul.mubr.msk.bf16.vlgmr.msra.gmra.mxu1 %vm1331_vm3, %v1343_v42 }
 0x45e   : > { %1490 = vmatpush1.bf16.msra.mxu1 %v2259_v41  ;;  %1521 = vmatprep.mubr.bf16.mxu1 %v2728_v57 }
 0x45f   : > { %1491 = vmatprep.subr.bf16.mxu1 %v2264_v43 }
 0x462   : > { %1492 = vmatpush1.bf16.msra.mxu1 %v2262_v44 }
 0x463   : > { %1493 = vmatprep.subr.bf16.mxu1 %v2267_v45 }
 0x466   : > { %1494 = vmatpush1.bf16.msra.mxu1 %v2265_v46 }
 0x467   : > { %1495 = vmatprep.subr.bf16.mxu1 %v2270_v47 }
 0x46a   : > { %1496 = vmatpush1.bf16.msra.mxu1 %v2268_v48 }
 0x46b   : > { %1497 = vmatprep.subr.bf16.mxu1 %v2273_v49 }
 0x46e   : > { %1498 = vmatpush1.bf16.msra.mxu1 %v2271_v50 }
 0x46f   : > { %1499 = vmatprep.subr.bf16.mxu1 %v2276_v51 }
 0x472   : > { %1500 = vmatpush1.bf16.msra.mxu1 %v2274_v52 }
 0x473   : > { %1501 = vmatprep.subr.bf16.mxu1 %v2279_v53 }
 0x476   : > { %1502 = vmatpush1.bf16.msra.mxu1 %v2277_v54 }
 0x477   : > { %1503 = vmatprep.subr.bf16.mxu1 %v2282_v55 }
 0x47a   : > { %1504 = vmatpush1.bf16.msra.mxu1 %v2280_v56 }
 0x51d   : > { %v1386_v58 = vpop.f32.mrf.mxu1 }
 0x51e   : > { %v1392_v59 = vpack.c.bf16 %v1386_v58, %v1386_v58 }
 0x51f   : > { %v2046_v60 = vpop.f32.mrf.mxu1 }
 0x520   : > { %1522 = vmatmul.mubr.bf16.vlgmr.msra.gmra.mxu1 %v1392_v59 }
 0x521   : > { %v1389_v61 = vpop.f32.mrf.mxu1 }
 0x523   : > { %v2047_v62 = vpop.f32.mrf.mxu1 }
 0x5e0   : > { %v1523_v63 = vpop.f32.mrf.mxu1 }
 0x5e2   : > { %v1525_v0 = vpop.f32.mrf.mxu1  ;;  %1533 = sbr.rel (%p1954_p6) target bundleno = 1518 (0x5ee), region = 108 }
 0x5e4   : > { %v1527_v1 = vpop.f32.mrf.mxu1 }
 0x5e6   : > { %v1528_v2 = vpop.f32.mrf.mxu1 }
 0x5e7   : > { %v1534_v3 = vld [vmem:[#allocation17] sm:$0x3]  ;;  %v1538_v4 = vsub.s32 0, %v3196_v24  ;;  %v1542_v5 = vsub.s32 1, %v3196_v24 }
 0x5e9   : > { %v1539_v6 = vrot.slane %v1534_v3, %v1538_v4  ;;  %v1543_v7 = vrot.slane %v1534_v3, %v1542_v5 }
 0x5eb   : > { %v1546_v8 = vadd.f32 %v1539_v6, %v1523_v63  ;;  %v1547_v9 = vadd.f32 %v1543_v7, %v1525_v0 }
 0x5ed   : > { %1548 = vst [vmem:[#allocation2] sm:$0xff] %v1546_v8  ;;  %1549 = vst [vmem:[#allocation2 + $0x8] sm:$0xff] %v1547_v9 }
 0x5ee PF: > { %s3381_s6 = sld [smem:[#allocation31_spill]] }
 0x5f4   : > { %p1955_p7 = scmp.eq.s32.totalorder %s3381_s6, 0 }
 0x5f6   : > { %1553 = sbr.rel (%p1955_p7) target bundleno = 1535 (0x5ff), region = 112 }
 0x5fb   : > { %v1554_v10 = vld [vmem:[#allocation2] sm:$0xff]  ;;  %v1555_v11 = vld [vmem:[#allocation2 + $0x8] sm:$0xff] }
 0x5fc   : > { %v1556_v12 = vadd.f32 %v1554_v10, %v1523_v63  ;;  %v1557_v13 = vadd.f32 %v1555_v11, %v1525_v0 }
 0x5fe   : > { %1558 = vst [vmem:[#allocation2] sm:$0xff] %v1556_v12  ;;  %1559 = vst [vmem:[#allocation2 + $0x8] sm:$0xff] %v1557_v13 }
 0x5ff PF: > { %s3382_s8 = sld [smem:[#allocation31_spill]] }
 0x605   : > { %p1956_p8 = scmp.ne.s32.totalorder %s3382_s8, 1 }
 0x607   : > { %1563 = sbr.rel (%p1956_p8) target bundleno = 1550 (0x60e), region = 116 }
 0x60c   : > { %v1564_v14 = vld [vmem:[#allocation2] sm:$0xff]  ;;  %v1565_v15 = vld [vmem:[#allocation2 + $0x8] sm:$0xff] }
 0x60d   : > { %1566 = vst [vmem:[%s3220_s23] sm:$0xff] %v1564_v14  ;;  %1567 = vst [vmem:[%s3220_s23 + $0x8] sm:$0xff] %v1565_v15 }
 0x60e PF: > { %s3383_s11 = sld [smem:[#allocation32_spill]]  ;;  %s1583_s20 = sshll.u32 %s3220_s23, 4  ;;  %s1584_s20 = int_to_ptr.vmem [resolvable:$true] %s1583_s20 }
 0x60f   : > { %s3384_s1 = sld [smem:[#allocation51_spill]]  ;;  %s1569_s5 = scalar_lea.sflag [#allocation5], %s3080_s24 }
 0x610   : > { %s2565_s3 = scalar_lea.vmem %s1584_s20, 256  ;;  %p3385_p2 = scmp.ne.s32.totalorder %s3356_s14, 0 }
 0x611   : > { %p2566_p12 = scmp.ne.s32.totalorder %s1584_s20, %s2565_s3  ;;  %s2729_s28 = smov [#allocation20]  }
 0x612   : > { %s2569_s26 = sshll.u32 %s2729_s28, 4  ;;  %s2570_s26 = int_to_ptr.vmem [resolvable:$false] %s2569_s26 }
 0x613   : > { %p2567_p10 = pnand %p2566_p12, %p3385_p2  ;;  %s2571_s29 = scalar_lea.vmem %s2570_s26, 512 }
 0x614   : > { %s1965_s30 = sshll.u32 %s3383_s11, 8  ;;  %p2572_p4 = scmp.lt.s32.totalorder %s1584_s20, %s2570_s26 }
 0x615   : > { %s1581_s9 = scalar_lea.hbm %s3384_s1, %s1965_s30  ;;  %p2568_p5 = pneg %p2567_p10 }
 0x616   : > { %p2573_p13 = scmp.lt.s32.totalorder %s2571_s29, %s2565_s3 }
 0x618   : > { %p2574_p0 = por %p2573_p13, %p2572_p4 }
 0x61a   : > { %p2575_p1 = pnand %p2574_p0, %p2568_p5 }
 0x61c   : > { %2578 = shalt.err (!%p2575_p1)
}
 0x61d   : > { %s2579_s13 = scalar_lea.hbm %s1581_s9, 256  ;;  %s2583_s16 = scalar_lea.hbm %s3384_s1, 512 }
 0x61e   : > { %p2580_p3 = scmp.ne.s32.totalorder %s1581_s9, %s2579_s13  ;;  %p2584_p6 = scmp.lt.s32.totalorder %s1581_s9, %s3384_s1 }
 0x61f   : > { %p2585_p7 = scmp.lt.s32.totalorder %s2583_s16, %s2579_s13 }
 0x620   : > { %p2581_p9 = pnand %p2580_p3, %p3385_p2 }
 0x621   : > { %p2586_p8 = por %p2585_p7, %p2584_p6 }
 0x622   : > { %p2582_p11 = pneg %p2581_p9 }
 0x624   : > { %p2587_p12 = pnand %p2586_p8, %p2582_p11 }
 0x626   : > { %2590 = shalt.err (!%p2587_p12)
}
 0x627   : > { %2070 = dma.vmem_to_hbm [thread:$0]  (%p3385_p2), %s1584_s20, 256, %s1581_s9, %s1569_s5  }
 0x628 PF: > { %s3386_s17 = sld [smem:[#allocation30_spill]]  ;;  %p2111_p10 = scmp.ge.s32.totalorder %s2709_s27, 2 }
 0x629   : > { %s3387_s23 = sld [smem:[#allocation36_spill]] }
 0x62e   : > { %s1595_s6 = sand.u32 1, %s3386_s17  }
 0x62f   : > { %p3388_p5 = scmp.ne.s32.totalorder %s3387_s23, 0  ;;  %s1596_s8 = scalar_lea.sflag [#allocation5], %s1595_s6 }
 0x631   : > { %p2105_p4 = pnand %p2111_p10, %p3388_p5 }
 0x633   : > { %p2106_p13 = pneg %p2105_p4 }
 0x635   : > { %2664 = dma.done.wait (%p2106_p13), %s1596_s8, 256  }
 0x636   : > { %2666 = vsyncadd (%p2106_p13), %s1596_s8, 4294967040  ;;  %s42_s27 = sadd.s32 1, %s2709_s27   ;;  %s3389_s17 = sld [smem:[#allocation29_spill]] }
 0x637   : > { %p39_p0 = scmp.ge.s32.totalorder %s42_s27, 6   ;;  %s3390_s14 = smov %s2997_s18 }
 0x638   : > { %s3391_s24 = sld [smem:[#allocation33_spill]]  ;;  %s3394_s18 = smov %s2677_s19 }
 0x639   : > { %s3392_s11 = sld [smem:[#allocation38_spill]]  ;;  %s3395_s19 = smov %s2991_s0 }
 0x63a   : > { %s3393_s26 = sld [smem:[#allocation39_spill]]  ;;  %s3396_s20 = smov %s2685_s21 }
 0x63b   : > { %s3397_s21 = smov %s2689_s22  ;;  %s3398_s22 = smov %s3390_s14 }
 0x63c   : > { %s3399_s23 = smov %s2701_s25  ;;  %41 = sbr.rel (!%p39_p0) target bundleno = 32 (0x20), region = 226 }
 0x63f   : > { %s3400_s25 = smov %s3392_s11 }
 0x641   :  { %1601 = vsyncpa [#allocation4], 1 }
 0x642   :  { %1603 = vsyncpa [#allocation4 + $0x1], 1 }
 0x643   :  { %1604 = vsyncpa [#allocation7], 1 }
 0x644   :  { %1606 = vsyncpa [#allocation7 + $0x1], 1 }
 0x645   :  { %1607 = vsyncpa [#allocation10], 1 }
 0x646   :  { %1609 = vsyncpa [#allocation10 + $0x1], 1 }
 0x647   :  { %1610 = vsyncpa [#allocation13], 1 }
 0x648   :  { %1612 = vsyncpa [#allocation13 + $0x1], 1 }
 0x649   :  { %1613 = vsyncpa [#allocation16], 1 }
 0x64a   :  { %1615 = vsyncpa [#allocation16 + $0x1], 1 }
 0x64b   :  { %1616 = vsyncpa [#allocation19], 1 }
 0x64c   :  { %1618 = vsyncpa [#allocation19 + $0x1], 1 }
 0x64d   :  { %1619 = vsyncpa [#allocation5], 1 }
 0x64e   :  { %1621 = vsyncpa [#allocation5 + $0x1], 1 }

</bundles_post_ra>
